<compile_context>
chip_gen: v7x
topology: tpu7x:2x2x1
jax: 0.10.0
libtpu: 0.0.40
codegen_flags: <defaults>
</compile_context>

<pallas_src>
import jax
import jax.numpy as jnp
from jax.experimental import pallas as pl
from jax.experimental.pallas import tpu as pltpu


def _round_up(x, m):
    return (x + m - 1) // m * m


def cqnn_kernel(x_ref, p1_ref, p2_ref, o_ref):
    # x:  (9,  TB)    features on sublanes, batch on lanes (lane-dense)
    # p1: (NQ, 10)    [ linear1.weight | linear1.bias + qnn_ansatz_angle ]
    # p2: (9,  NQ+1)  [ linear2.weight | linear2.bias ]
    # o:  (9,  TB)
    x = x_ref[...]
    p1 = p1_ref[...]
    p2 = p2_ref[...]
    nf = x.shape[0]            # 9
    nq = p1.shape[0]           # n_qubits

    w1 = p1[:, :nf]
    b1q = p1[:, nf:nf + 1]
    w2 = p2[:, :nq]
    b2 = p2[:, nq:nq + 1]

    # linear1 (+ folded QNN ansatz angle).  K=9 is tiny, but the MXU is
    # otherwise idle while the VALU carries the cos polynomial, so offload the
    # contraction to the MXU instead of unrolled VPU MACs.
    h = jnp.dot(w1, x, preferred_element_type=jnp.float32) + b1q       # (NQ, TB)

    # QNN surrogate:  <Z_i> = cos(h_i)   (VALU polynomial; no EUP cos)
    q = jnp.cos(h)

    # linear2 + tanh  (tanh goes to the EUP slot)
    y = jnp.dot(w2, q, preferred_element_type=jnp.float32) + b2        # (9, TB)
    o_ref[...] = jnp.tanh(y)


def cqnn_forward_fm(state_fm, w1, b1, qw, w2, b2, *, tb=32768, core_parallel=False):
    """Feature-major entry point (preferred): state_fm is (9, B) -> (9, B).

    PyTorch-layout params: w1 (NQ,9), b1 (NQ,), qw (NQ,), w2 (9,NQ), b2 (9,).
    """
    nf, B = state_fm.shape
    nq = w1.shape[0]

    # Pack parameters into two tiny resident operands; fold the QNN ansatz
    # angle into the linear1 bias column (one fewer operand and one fewer add).
    p1 = jnp.concatenate(
        [w1.astype(jnp.float32), (b1 + qw).reshape(nq, 1).astype(jnp.float32)], axis=1)
    p2 = jnp.concatenate(
        [w2.astype(jnp.float32), b2.reshape(nf, 1).astype(jnp.float32)], axis=1)

    # Batch-tile selection:
    #  * round a user-supplied tb up to a lane multiple (Mosaic needs 128-multiples),
    #  * cap tb so the grid has >= 2 steps when B allows (keeps both v7x TCs busy),
    #  * do NOT pad B up to a multiple of tb: Pallas masks the ragged last block.
    tb = _round_up(max(int(tb), 128), 128)
    tb = min(tb, max(128, _round_up(pl.cdiv(B, 2), 128)))
    grid = (pl.cdiv(B, tb),)

    const = lambda i: (0, 0)
    cost = pl.CostEstimate(
        flops=2 * B * (nf * nq + nq * nf),
        transcendentals=B * (nq + nf),
        bytes_accessed=4 * (2 * nf * B + p1.size + p2.size),
    )

    return pl.pallas_call(
        cqnn_kernel,
        out_shape=jax.ShapeDtypeStruct((nf, B), jnp.float32),
        grid=grid,
        in_specs=[
            pl.BlockSpec((nf, tb), lambda i: (0, i)),   # batch tile (batch on lanes)
            pl.BlockSpec((nq, nf + 1), const),          # packed linear1 params, resident
            pl.BlockSpec((nf, nq + 1), const),          # packed linear2 params, resident
        ],
        out_specs=pl.BlockSpec((nf, tb), lambda i: (0, i)),
        compiler_params=pltpu.CompilerParams(
            # PARALLEL shards the batch-tile axis across TensorCores on
            # multi-TC parts (v7x).  Flip core_parallel=True to use
            # CORE_PARALLEL if a trace shows one TC idle.
            dimension_semantics=(
                (pltpu.CORE_PARALLEL,) if core_parallel else (pltpu.PARALLEL,)),
            # Peak VMEM at tb=32768 is ~16 MiB (double-buffered 16-row in/out
            # tiles + h/q/y temporaries); 32 MiB fits v5e/v6e/v7x physical VMEM.
            vmem_limit_bytes=32 * 1024 * 1024,
        ),
        cost_estimate=cost,
    )(state_fm.astype(jnp.float32), p1, p2)


def cqnn_forward(state, w1, b1, qw, w2, b2, *, tb=32768):
    """Batch-major convenience wrapper matching the PyTorch API: (B, 9) -> (B, 9).

    The transposes here are extra HBM passes that XLA cannot fuse through the
    pallas_call; prefer cqnn_forward_fm for large batches.
    """
    out_fm = cqnn_forward_fm(state.T, w1, b1, qw, w2, b2, tb=tb)
    return out_fm.T


def make_params(key, n_qubits=10):
    # PyTorch Linear layouts: weight (out, in), bias (out,)
    k1, k2, k3, k4, k5 = jax.random.split(key, 5)
    lim1 = 1.0 / jnp.sqrt(9.0)
    w1 = jax.random.uniform(k1, (n_qubits, 9), jnp.float32, -lim1, lim1)
    b1 = jax.random.uniform(k2, (n_qubits,), jnp.float32, -lim1, lim1)
    # QNN ansatz weights (one RY angle per qubit)
    qw = jax.random.uniform(k3, (n_qubits,), jnp.float32, 0.0, 2.0 * jnp.pi)
    lim2 = 1.0 / jnp.sqrt(float(n_qubits))
    w2 = jax.random.uniform(k4, (9, n_qubits), jnp.float32, -lim2, lim2)
    b2 = jax.random.uniform(k5, (9,), jnp.float32, -lim2, lim2)
    return w1, b1, qw, w2, b2


def reference_forward(state, w1, b1, qw, w2, b2):
    hp = jax.lax.Precision.HIGHEST
    h = jnp.dot(state, w1.T, precision=hp) + b1
    q = jnp.cos(h + qw)
    return jnp.tanh(jnp.dot(q, w2.T, precision=hp) + b2)


if __name__ == "__main__":
    key = jax.random.PRNGKey(0)
    k_x, k_p = jax.random.split(key)

    batch, n_qubits = 8, 10
    # 3x3 tic-tac-toe board flattened to 9 features per sample
    state = jax.random.uniform(k_x, (batch, 9), jnp.float32, -1.0, 1.0)
    params = make_params(k_p, n_qubits=n_qubits)

    # Batch-major path (PyTorch-compatible API).
    out = jax.jit(cqnn_forward)(state, *params)
    out = jax.block_until_ready(out)
    ref = reference_forward(state, *params)
    assert out.shape == (batch, 9)
    assert jnp.allclose(out, ref, atol=1e-4, rtol=1e-4)

    # Feature-major fast path with a ragged, multi-tile batch (no padding,
    # masked final block, 2 grid steps).
    big_b = 300
    state_big = jax.random.uniform(k_x, (big_b, 9), jnp.float32, -1.0, 1.0)
    out_fm = jax.jit(cqnn_forward_fm)(state_big.T, *params)
    out_fm = jax.block_until_ready(out_fm)
    ref_big = reference_forward(state_big, *params)
    assert out_fm.shape == (9, big_b)
    assert jnp.allclose(out_fm.T, ref_big, atol=1e-4, rtol=1e-4)

    print("KERNEL_OK")
</pallas_src>

<mosaic_0001>
module attributes {stable_mosaic.version = 11 : i64} {
  func.func @cqnn_kernel(%arg0: i32, %arg1: memref<9x128xf32, #tpu.memory_space<vmem>>, %arg2: memref<10x10xf32, #tpu.memory_space<vmem>>, %arg3: memref<9x11xf32, #tpu.memory_space<vmem>>, %arg4: memref<9x128xf32, #tpu.memory_space<vmem>>) attributes {dimension_semantics = [#tpu.dimension_semantics<parallel>], iteration_bounds = array<i64: 1>, scalar_prefetch = 0 : i64, scratch_operands = 0 : i64, tpu.core_type = #tpu.core_type<tc>, window_params = [{transform_indices = @transform_0, window_bounds = array<i64: 9, 128>}, {pipeline_mode = #tpu.pipeline_mode<synchronous>, transform_indices = @transform_1, window_bounds = array<i64: 10, 10>}, {pipeline_mode = #tpu.pipeline_mode<synchronous>, transform_indices = @transform_2, window_bounds = array<i64: 9, 11>}, {transform_indices = @transform_3, window_bounds = array<i64: 9, 128>}]} {
    %c0 = arith.constant 0 : index
    %c0_0 = arith.constant 0 : index
    %0 = vector.load %arg1[%c0, %c0_0] : memref<9x128xf32, #tpu.memory_space<vmem>>, vector<9x128xf32>
    %c0_1 = arith.constant 0 : index
    %c0_2 = arith.constant 0 : index
    %1 = vector.load %arg2[%c0_1, %c0_2] : memref<10x10xf32, #tpu.memory_space<vmem>>, vector<10x10xf32>
    %c0_3 = arith.constant 0 : index
    %c0_4 = arith.constant 0 : index
    %2 = vector.load %arg3[%c0_3, %c0_4] : memref<9x11xf32, #tpu.memory_space<vmem>>, vector<9x11xf32>
    %3 = vector.extract_strided_slice %1 {offsets = [0, 0], sizes = [10, 9], strides = [1, 1]} : vector<10x10xf32> to vector<10x9xf32>
    %4 = vector.extract_strided_slice %1 {offsets = [0, 9], sizes = [10, 1], strides = [1, 1]} : vector<10x10xf32> to vector<10x1xf32>
    %5 = vector.extract_strided_slice %2 {offsets = [0, 0], sizes = [9, 10], strides = [1, 1]} : vector<9x11xf32> to vector<9x10xf32>
    %6 = vector.extract_strided_slice %2 {offsets = [0, 10], sizes = [9, 1], strides = [1, 1]} : vector<9x11xf32> to vector<9x1xf32>
    %cst = arith.constant dense<0.000000e+00> : vector<10x128xf32>
    %7 = tpu.matmul %3, %0, %cst {dimension_numbers = #tpu.dot_dimension_numbers<[1], [0], [0], [1], [0, 0, 1, 1], [], []>} : vector<10x9xf32>, vector<9x128xf32>, vector<10x128xf32> -> vector<10x128xf32>
    %8 = vector.broadcast %4 : vector<10x1xf32> to vector<10x128xf32>
    %9 = arith.addf %7, %8 : vector<10x128xf32>
    %10 = math.cos %9 : vector<10x128xf32>
    %cst_5 = arith.constant dense<0.000000e+00> : vector<9x128xf32>
    %11 = tpu.matmul %5, %10, %cst_5 {dimension_numbers = #tpu.dot_dimension_numbers<[1], [0], [0], [1], [0, 0, 1, 1], [], []>} : vector<9x10xf32>, vector<10x128xf32>, vector<9x128xf32> -> vector<9x128xf32>
    %12 = vector.broadcast %6 : vector<9x1xf32> to vector<9x128xf32>
    %13 = arith.addf %11, %12 : vector<9x128xf32>
    %14 = math.tanh %13 : vector<9x128xf32>
    %c0_6 = arith.constant 0 : index
    %c0_7 = arith.constant 0 : index
    %15 = vector.load %arg4[%c0_6, %c0_7] : memref<9x128xf32, #tpu.memory_space<vmem>>, vector<9x128xf32>
    tpu.vector_store %arg4[%c0_6, %c0_7], %14 {strides = array<i32>} : memref<9x128xf32, #tpu.memory_space<vmem>>, vector<9x128xf32>,
    return
  }
  func.func @transform_0(%arg0: i32) -> (i32, i32) {
    %c0_i32 = arith.constant 0 : i32
    %c0_i32_0 = arith.constant 0 : i32
    return %c0_i32, %arg0 : i32, i32
  }
  func.func @transform_1(%arg0: i32) -> (i32, i32) {
    %c0_i32 = arith.constant 0 : i32
    %c0_i32_0 = arith.constant 0 : i32
    %c0_i32_1 = arith.constant 0 : i32
    return %c0_i32, %c0_i32_0 : i32, i32
  }
  func.func @transform_2(%arg0: i32) -> (i32, i32) {
    %c0_i32 = arith.constant 0 : i32
    %c0_i32_0 = arith.constant 0 : i32
    %c0_i32_1 = arith.constant 0 : i32
    return %c0_i32, %c0_i32_0 : i32, i32
  }
  func.func @transform_3(%arg0: i32) -> (i32, i32) {
    %c0_i32 = arith.constant 0 : i32
    %c0_i32_0 = arith.constant 0 : i32
    return %c0_i32, %arg0 : i32, i32
  }
}

</mosaic_0001>

<bundles_post_ra>
// kernel: cqnn_forward.1
= control target key start
LH: loop header
LB: loop body
LE: loop exit
PB: predicated region body
PF: predicated region fallthrough
CT: control target
= control target key end

     0   :  { %vm35_vm0 = vcmask 1040384   ;;  %vm30_vm1 = vcmask 72704   ;;  %vm502_vm2 = vmmov 1   ;;  %v503_v2 = vmov 9   ;;  %s641_s0 = inlined_call_operand.vmem [shape: f32[9,8], index: 0, kind: input, shape index: {}]   ;;  %s642_s1 = inlined_call_operand.vmem [shape: f32[10,10], index: 1, kind: input, shape index: {}]   ;;  %s643_s2 = inlined_call_operand.vmem [shape: f32[9,11], index: 2, kind: input, shape index: {}]   ;;  %s644_s3 = inlined_call_operand.vmem [shape: f32[9,8], index: 3, kind: output, shape index: {}]  }
   0x1   :  { %v14_v0 = vld [vmem:[%s641_s0] sm:$0xff]  ;;  %v15_v1 = vld [vmem:[%s641_s0 + $0x8] sm:$0x1]  ;;  %vm459_vm3 = vmpackc.low %vm35_vm0, %vm502_vm2  ;;  %487 = vset.pattern.permute.xlu0 %v503_v2  ;;  %vm330_vm4 = vcmask 80896   ;;  %v504_v7 = vmov 10  }
   0x2   :  { %v458_v3 = vpack.c.bf16 %v15_v1, %v14_v0  ;;  %v16_v4 = vld [vmem:[%s642_s1] sm:$0xff]  ;;  %v17_v5 = vld [vmem:[%s642_s1 + $0x8] sm:$0x3]  ;;  %488 = vset.pattern.permute.xlu1 %v504_v7  ;;  %v505_v35 = vmov 683565275  }
   0x3   :  { %448 = vmatprep.mubr.msk.f32.mxu0 %vm30_vm1, %v16_v4  ;;  %22 = vperm.xlu0 %487, %v16_v4   ;;  %v18_v6 = vld [vmem:[%s643_s2] sm:$0xff]  ;;  %v551_v8 = vld [vmem:[%s643_s2 + $0x8] sm:$0x1]  ;;  %v506_v39 = vmov 2475754826  }
   0x4   :  { %460 = vmatprep.subr.msk.bf16.mxu0 %vm459_vm3, %v458_v3  ;;  %455 = vmatprep.mubr.msk.f32.mxu1 %vm330_vm4, %v18_v6  ;;  %v507_v41 = vmov 2131351028   ;;  %v508_v43 = vmov 2102212464   ;;  %v509_v45 = vmov 920167782  }
   0x5   :  { %463 = vmatpush3.bf16.msk.msra.mxu0 %vm459_vm3, %v458_v3  ;;  %322 = vperm.xlu1 %488, %v18_v6   ;;  %v510_v52 = vmov 1326507024  }
   0x7   :  { %27 = vperm.xlu0 %487, %v17_v5  }
   0x8   :  { %449 = vmatmul.mubr.msk.f32.vlgmr.msra.gmra.mrb[0].mxu0 %vm30_vm1, %v17_v5 }
   0x9   :  { %327 = vperm.xlu1 %488, %v551_v8  }
   0xb   :  { %489 = vset.pattern.permute.xlu0 %v504_v7 }
  0x82   :  { %v23_v9 = vpop.permute.xlu0 %22 }
  0x86   :  { %v28_v10 = vpop.permute.xlu0 %27 }
  0xdb   :  { %v450_v11 = vpop.f32.mrb[0].mxu0 }
  0xdc   :  { %v554_v12 = vadd.f32 %v450_v11, %v28_v10  ;;  %v105_v13 = vpop.f32.mrb[1].mxu0 }
  0xdd   :  { %v556_v14 = vadd.f32 %v105_v13, %v23_v9 }
  0xde   :  { %v217_v15 = vand.u32 2147483647, %v554_v12  ;;  %v220_v16 = vand.u32 2139095040, %v554_v12 }
  0xdf   :  { %v117_v17 = vand.u32 2139095040, %v556_v14  ;;  %v114_v20 = vand.u32 2147483647, %v556_v14 }
  0xe0   :  { %v221_v18 = vshrl.u32 %v220_v16, 23  ;;  %v224_v19 = vand.u32 8388607, %v217_v15 }
  0xe1   :  { %v118_v21 = vshrl.u32 %v117_v17, 23  ;;  %v566_v26 = vand.u32 8388607, %v114_v20 }
  0xe2   :  { %v429_v22 = vadd.s32 4294967169, %v221_v18  ;;  %v225_v25 = vor.u32 8388608, %v224_v19 }
  0xe3   :  { %v425_v23 = vadd.s32 4294967169, %v118_v21  ;;  %v122_v33 = vor.u32 8388608, %v566_v26 }
  0xe4   :  { %v227_v24 = vadd.s32 1, %v429_v22  ;;  %v568_v32 = vshll.u32 %v225_v25, 8 }
  0xe5   :  { %v124_v27 = vadd.s32 1, %v425_v23 }
  0xe6   :  { %vm228_vm5 = vcmp.gt.s32.totalorder %v227_v24, 0 }
  0xe7   :  { %v229_v28 = vsel %vm228_vm5, %v227_v24, 0  ;;  %vm125_vm6 = vcmp.gt.s32.totalorder %v124_v27, 0  ;;  %vm219_vm5 = vcmp.lt.s32.totalorder %v554_v12, 0 }
  0xe8   :  { %v230_v29 = vshrl.u32 %v229_v28, 5  ;;  %v231_v30 = vand.u32 31, %v229_v28  ;;  %v126_v31 = vsel %vm125_vm6, %v124_v27, 0  ;;  %v162_v28 = vshll.u32 %v122_v33, 8 }
  0xe9   :  { %v571_v37 = vshrl.u32 %v126_v31, 5  ;;  %v128_v38 = vand.u32 31, %v126_v31  ;;  %vm609_vm6 = vcmp.le.f32.partialorder %v217_v15, 0.7853982 }
  0xea   :  { %v232_v34 = vsub.s32 32, %v231_v30  ;;  %v234_v36 = vshll.u32 %v505_v35, %v231_v30  ;;  %v237_v40 = vshll.u32 %v506_v39, %v231_v30  ;;  %v240_v42 = vshll.u32 %v507_v41, %v231_v30 }
  0xeb   :  { %v243_v44 = vshll.u32 %v508_v43, %v231_v30  ;;  %v246_v46 = vshll.u32 %v509_v45, %v231_v30  ;;  %vm249_vm7 = vcmp.lt.s32.totalorder %v230_v29, 1  ;;  %vm250_vm8 = vcmp.lt.s32.totalorder %v230_v29, 2 }
  0xec   :  { %v235_v47 = vshrl.u32 %v506_v39, %v232_v34  ;;  %v238_v48 = vshrl.u32 %v507_v41, %v232_v34  ;;  %v241_v49 = vshrl.u32 %v508_v43, %v232_v34  ;;  %v233_v50 = vshrl.u32 %v505_v35, %v232_v34 }
  0xed   :  { %v244_v51 = vshrl.u32 %v509_v45, %v232_v34  ;;  %v247_v53 = vshrl.u32 %v510_v52, %v232_v34  ;;  %v129_v57 = vsub.s32 32, %v128_v38  ;;  %vm251_vm9 = vcmp.lt.s32.totalorder %v230_v29, 3 }
  0xee   :  { %v236_v54 = vor.u32 %v235_v47, %v234_v36  ;;  %v239_v55 = vor.u32 %v238_v48, %v237_v40  ;;  %v242_v56 = vor.u32 %v241_v49, %v240_v42  ;;  %vm252_vm10 = vcmp.lt.s32.totalorder %v230_v29, 4 }
  0xef   :  { %v245_v58 = vor.u32 %v244_v51, %v243_v44  ;;  %v248_v59 = vor.u32 %v247_v53, %v246_v46  ;;  %v131_v3 = vshll.u32 %v505_v35, %v128_v38  ;;  %v132_v6 = vshrl.u32 %v506_v39, %v129_v57 }
  0xf0   :  { %v253_v60 = vsel %vm249_vm7, %v233_v50, %v236_v54  ;;  %v254_v61 = vsel %vm252_vm10, %v242_v56, 2102212464  ;;  %v257_v62 = vsel %vm249_vm7, %v236_v54, %v239_v55  ;;  %v261_v63 = vsel %vm249_vm7, %v239_v55, %v242_v56 }
  0xf1   :  { %v255_v0 = vsel %vm251_vm9, %v239_v55, %v254_v61  ;;  %v258_v1 = vsel %vm252_vm10, %v245_v58, 920167782  ;;  %v262_v2 = vsel %vm252_vm10, %v248_v59, 1326507024  ;;  %v134_v7 = vshll.u32 %v506_v39, %v128_v38 }
  0xf2   :  { %v259_v4 = vsel %vm251_vm9, %v242_v56, %v258_v1  ;;  %v263_v5 = vsel %vm251_vm9, %v245_v58, %v262_v2  ;;  %v256_v9 = vsel %vm250_vm8, %v253_v60, %v255_v0  ;;  %v135_v13 = vshrl.u32 %v507_v41, %v129_v57 }
  0xf3   :  { %v260_v10 = vsel %vm250_vm8, %v257_v62, %v259_v4  ;;  %v264_v11 = vsel %vm250_vm8, %v261_v63, %v263_v5  ;;  %v133_v21 = vor.u32 %v132_v6, %v131_v3  ;;  %v137_v23 = vshll.u32 %v507_v41, %v128_v38 }
  0xf4   :  { %v580_v16 = vmul.u32.u64.low %v568_v32, %v264_v11  ;;  %v581_v17 = vmul.u32.u64.high %v568_v32, %v264_v11, %v580_v16  ;;  %v584_v18 = vmul.u32.u64.low %v568_v32, %v260_v10  ;;  %v585_v19 = vmul.u32.u64.high %v568_v32, %v260_v10, %v584_v18 }
  0xf5   :  { %v136_v22 = vor.u32 %v135_v13, %v134_v7  ;;  %v138_v24 = vshrl.u32 %v508_v43, %v129_v57  ;;  %v140_v25 = vshll.u32 %v508_v43, %v128_v38  ;;  %v141_v26 = vshrl.u32 %v509_v45, %v129_v57 }
  0xf6   :  { %v144_v27 = vshrl.u32 %v510_v52, %v129_v57  ;;  %v272_v29 = vmul.u32 %v568_v32, %v256_v9  ;;  %v130_v30 = vshrl.u32 %v505_v35, %v129_v57  ;;  %v143_v34 = vshll.u32 %v509_v45, %v128_v38 }
  0xf7   :  { %v139_v31 = vor.u32 %v138_v24, %v137_v23  ;;  %vm274_vm11 = vc.u32 %v581_v17, %v584_v18  ;;  %v275_v36 = vadd.s32 1, %v585_v19  ;;  %v142_v39 = vor.u32 %v141_v26, %v140_v25 }
  0xf8   :  { %vm146_vm12 = vcmp.lt.s32.totalorder %v571_v37, 1  ;;  %v145_v40 = vor.u32 %v144_v27, %v143_v34  ;;  %vm148_vm13 = vcmp.lt.s32.totalorder %v571_v37, 3  ;;  %vm149_vm14 = vcmp.lt.s32.totalorder %v571_v37, 4 }
  0xf9   :  { %v154_v41 = vsel %vm146_vm12, %v133_v21, %v136_v22  ;;  %v276_v33 = vsel %vm274_vm11, %v275_v36, %v585_v19  ;;  %v151_v42 = vsel %vm149_vm14, %v139_v31, 2102212464  ;;  %v155_v32 = vsel %vm149_vm14, %v142_v39, 920167782 }
  0xfa   :  { %v158_v35 = vsel %vm146_vm12, %v136_v22, %v139_v31  ;;  %v277_v43 = vadd.s32 %v276_v33, %v272_v29  ;;  %vm147_vm15 = vcmp.lt.s32.totalorder %v571_v37, 2  ;;  %v156_v38 = vsel %vm148_vm13, %v139_v31, %v155_v32 }
  0xfb   :  { %v159_v44 = vsel %vm149_vm14, %v145_v40, 1326507024  ;;  %v150_v45 = vsel %vm146_vm12, %v130_v30, %v133_v21  ;;  %v152_v46 = vsel %vm148_vm13, %v136_v22, %v151_v42  ;;  %v157_v47 = vsel %vm147_vm15, %v154_v41, %v156_v38 }
  0xfc   :  { %v160_v48 = vsel %vm148_vm13, %v142_v39, %v159_v44  ;;  %v278_v49 = vadd.s32 536870912, %v277_v43  ;;  %v595_v51 = vmul.u32.u64.low %v162_v28, %v157_v47  ;;  %v596_v52 = vmul.u32.u64.high %v162_v28, %v157_v47, %v595_v51 }
  0xfd   :  { %v161_v50 = vsel %vm147_vm15, %v158_v35, %v160_v48  ;;  %v153_v56 = vsel %vm147_vm15, %v150_v45, %v152_v46  ;;  %v273_v9 = vadd.s32 %v584_v18, %v581_v17  ;;  %vm116_vm7 = vcmp.lt.s32.totalorder %v556_v14, 0 }
  0xfe   :  { %v598_v53 = vmul.u32.u64.low %v162_v28, %v161_v50  ;;  %v599_v54 = vmul.u32.u64.high %v162_v28, %v161_v50, %v598_v53  ;;  %v279_v55 = vshrl.u32 %v278_v49, 30  ;;  %v172_v58 = vadd.s32 1, %v596_v52 }
  0xff   :  { %v169_v37 = vmul.u32 %v162_v28, %v153_v56  ;;  %vm621_vm8 = vcmp.le.f32.partialorder %v114_v20, 0.7853982  ;;  %vm309_vm12 = vweird.f32 %v554_v12  ;;  %vm335_vm15 = vcmask 1041408  }
 0x100   :  { %v280_v57 = vshll.u32 %v279_v55, 30  ;;  %vm171_vm0 = vc.u32 %v599_v54, %v595_v51  ;;  %v170_v30 = vadd.s32 %v595_v51, %v599_v54  ;;  %v303_v35 = vsub.s32 4, %v279_v55 }
 0x101   :  { %v173_v60 = vsel %vm171_vm0, %v172_v58, %v596_v52 }
 0x102   :  { %v281_v59 = vsub.s32 %v277_v43, %v280_v57  ;;  %v174_v61 = vadd.s32 %v173_v60, %v169_v37  ;;  %v304_v46 = vsel %vm219_vm5, %v303_v35, %v279_v55 }
 0x103   :  { %v306_v49 = vsel %vm609_vm6, 0, %v304_v46 }
 0x104   :  { %v283_v62 = vsub.s32 0, %v281_v59  ;;  %v175_v63 = vadd.s32 536870912, %v174_v61  ;;  %v310_v53 = vand.u32 3, %v306_v49 }
 0x106   :  { %v430_v0 = vmin.u32 %v283_v62, %v281_v59  ;;  %v176_v1 = vshrl.u32 %v175_v63, 30  ;;  %vm315_vm9 = vcmp.eq.s32.totalorder %v310_v53, 2  ;;  %vm312_vm10 = vcmp.eq.s32.totalorder %v310_v53, 0 }
 0x107   :  { %vm311_vm11 = vcmp.lt.s32.totalorder %v310_v53, 2 }
 0x108   :  { %v285_v2 = vclz %v430_v0  ;;  %v177_v3 = vshll.u32 %v176_v1, 30  ;;  %v200_v51 = vsub.s32 4, %v176_v1 }
 0x10a   :  { %v431_v4 = vadd.s32 4294967294, %v285_v2  ;;  %v178_v5 = vsub.s32 %v174_v61, %v177_v3  ;;  %v201_v56 = vsel %vm116_vm7, %v200_v51, %v176_v1 }
 0x10b   :  { %v203_v20 = vsel %vm621_vm8, 0, %v201_v56 }
 0x10c   :  { %vm432_vm1 = vcmp.lt.s32.totalorder %v431_v4, 0  ;;  %v180_v7 = vsub.s32 0, %v178_v5  ;;  %v207_v62 = vand.u32 3, %v203_v20 }
 0x10d   :  { %v288_v6 = vsel %vm432_vm1, 0, %v431_v4  ;;  %vm206_vm1 = vweird.f32 %v556_v14 }
 0x10e   :  { %v289_v10 = vsub.s32 32, %v288_v6  ;;  %v293_v11 = vsub.s32 4294967266, %v288_v6  ;;  %v426_v13 = vmin.u32 %v180_v7, %v178_v5  ;;  %v290_v16 = vshll.u32 %v281_v59, %v288_v6  ;;  %v323_v7 = vpop.permute.xlu1 %322 }
 0x10f   :  { %vm212_vm13 = vcmp.eq.s32.totalorder %v207_v62, 2  ;;  %vm209_vm14 = vcmp.eq.s32.totalorder %v207_v62, 0  ;;  %vm208_vm0 = vcmp.lt.s32.totalorder %v207_v62, 2 }
 0x110   :  { %v291_v19 = vshrl.u32 %v273_v9, %v289_v10  ;;  %v294_v21 = vadd.s32 127, %v293_v11  ;;  %v182_v22 = vclz %v426_v13 }
 0x112   :  { %v292_v23 = vor.u32 %v291_v19, %v290_v16  ;;  %v295_v24 = vshll.u32 %v294_v21, 23  ;;  %v427_v25 = vadd.s32 4294967294, %v182_v22  ;;  %v328_v9 = vpop.permute.xlu1 %327 }
 0x114   :  { %v296_v26 = vor.u32 4788187, %v295_v24  ;;  %vm428_vm3 = vcmp.lt.s32.totalorder %v427_v25, 0  ;;  %v299_v28 = vcvt.s32.f32 %v292_v23 }
 0x115   :  { %v185_v29 = vsel %vm428_vm3, 0, %v427_v25  ;;  %vm465_vm3 = vmpackc.low %vm335_vm15, %vm502_vm2 }
 0x116   :  { %v297_v27 = vand.u32 2147483647, %v296_v26  ;;  %v186_v31 = vsub.s32 32, %v185_v29  ;;  %v190_v34 = vsub.s32 4294967266, %v185_v29  ;;  %v187_v18 = vshll.u32 %v178_v5, %v185_v29 }
 0x118   :  { %v300_v17 = vmul.f32 %v299_v28, %v297_v27  ;;  %v188_v36 = vshrl.u32 %v170_v30, %v186_v31  ;;  %v191_v39 = vadd.s32 127, %v190_v34 }
 0x11a   :  { %v301_v40 = vxor.u32 2147483648, %v300_v17  ;;  %v189_v41 = vor.u32 %v188_v36, %v187_v18  ;;  %v192_v33 = vshll.u32 %v191_v39, 23 }
 0x11c   :  { %v302_v42 = vsel %vm219_vm5, %v301_v40, %v300_v17  ;;  %v193_v43 = vor.u32 4788187, %v192_v33  ;;  %v196_v45 = vcvt.s32.f32 %v189_v41 }
 0x11d   :  { %v305_v38 = vsel %vm609_vm6, %v554_v12, %v302_v42 }
 0x11e   :  { %490 = vcosq.f32 %v305_v38  ;;  %v194_v44 = vand.u32 2147483647, %v193_v43 }
 0x11f   :  { %492 = vsinq.f32 %v305_v38 }
 0x120   :  { %v197_v47 = vmul.f32 %v196_v45, %v194_v44 }
 0x122   :  { %v198_v48 = vxor.u32 2147483648, %v197_v47 }
 0x124   :  { %v199_v15 = vsel %vm116_vm7, %v198_v48, %v197_v47 }
 0x125   :  { %v202_v52 = vsel %vm621_vm8, %v556_v14, %v199_v15 }
 0x126   :  { %494 = vcosq.f32 %v202_v52 }
 0x127   :  { %496 = vsinq.f32 %v202_v52 }
 0x128   :  { %v491_v54 = vpop.eup %490 }
 0x129   :  { %v493_v55 = vpop.eup %492  ;;  %v316_v57 = vxor.u32 2147483648, %v491_v54 }
 0x12a   :  { %v313_v58 = vxor.u32 2147483648, %v493_v55 }
 0x12b   :  { %v317_v37 = vsel %vm315_vm9, %v316_v57, %v493_v55 }
 0x12c   :  { %v314_v59 = vsel %vm312_vm10, %v491_v54, %v313_v58 }
 0x12d   :  { %v318_v60 = vsel %vm311_vm11, %v314_v59, %v317_v37 }
 0x12e   :  { %v319_v61 = vsel %vm309_vm12, nan, %v318_v60 }
 0x130   :  { %v495_v63 = vpop.eup %494 }
 0x131   :  { %v497_v0 = vpop.eup %496  ;;  %v213_v2 = vxor.u32 2147483648, %v495_v63 }
 0x132   :  { %v210_v3 = vxor.u32 2147483648, %v497_v0 }
 0x133   :  { %v214_v1 = vsel %vm212_vm13, %v213_v2, %v497_v0 }
 0x134   :  { %v211_v4 = vsel %vm209_vm14, %v495_v63, %v210_v3 }
 0x135   :  { %v215_v5 = vsel %vm208_vm0, %v211_v4, %v214_v1 }
 0x136   :  { %v216_v6 = vsel %vm206_vm1, nan, %v215_v5 }
 0x137   :  { %v464_v12 = vpack.c.bf16 %v319_v61, %v216_v6 }
 0x139   :  { %466 = vmatprep.subr.msk.bf16.mxu1 %vm465_vm3, %v464_v12 }
 0x13a   :  { %469 = vmatpush3.bf16.msk.msra.mxu1 %vm465_vm3, %v464_v12 }
 0x13d   :  { %456 = vmatmul.mubr.msk.f32.vlgmr.msra.gmra.mrb[0].mxu1 %vm330_vm4, %v551_v8 }
 0x210   :  { %v457_v10 = vpop.f32.mrb[0].mxu1 }
 0x211   :  { %v411_v11 = vadd.f32 %v457_v10, %v328_v9  ;;  %v405_v13 = vpop.f32.mrb[1].mxu1 }
 0x212   :  { %v406_v16 = vadd.f32 %v405_v13, %v323_v7 }
 0x213   :  { %498 = vtanh.f32 %v411_v11 }
 0x214   :  { %500 = vtanh.f32 %v406_v16 }
 0x21d   :  { %v499_v19 = vpop.eup %498 }
 0x21e   :  { %v501_v14 = vpop.eup %500  ;;  %417 = vst [vmem:[%s644_s3 + $0x8] sm:$0x1] %v499_v19 }
 0x21f   :  { %416 = vst [vmem:[%s644_s3] sm:$0xff] %v501_v14 }

</bundles_post_ra>
